<compile_context>
chip_gen: v7x
topology: tpu7x:2x2x1
jax: 0.10.0
libtpu: 0.0.40
codegen_flags: <defaults>
</compile_context>

<pallas_src>
import jax
import jax.numpy as jnp
from jax.experimental import pallas as pl
from jax.experimental.pallas import tpu as pltpu

# ----------------------------- config ---------------------------------------
PATCH = 4            # patch size for the "backbone" patch embed
HIDDEN = 32          # hidden dim
NUM_CLASSES = 8      # detection classes
HEAD_N = 128         # fused (class|box) head width, zero-padded -> lane-dense
ROW_TILE = 1024      # queries (lanes) per grid step


def _round_up(x, m):
    return (x + m - 1) // m * m


# ----------------------------- fused kernel ---------------------------------
def fused_detect_kernel(x_ref, we_ref, wh_ref, scale_ref, out_ref):
    """patch-embed -> ReLU -> fused head -> postprocess, feature-major.

    x_ref:     (K, TM)          bf16 patch pixels, one query per lane
    we_ref:    (HIDDEN, K)      bf16 patch-embed weight (transposed)
    wh_ref:    (HEAD_N, HIDDEN) bf16 fused head weight (transposed; rows
                                [0,NC)=class logits, [NC,NC+4)=box, rest zero)
    scale_ref: (4, TM)          f32  per-query (W, H, W, H) scale
    out_ref:   (8, TM)          f32  packed lane-dense output:
                                rows 0-3 scaled xyxy, row 4 score,
                                row 5 label (as float), rows 6-7 zero
    """
    tm = out_ref.shape[1]

    # backbone: patch embed + ReLU (bf16 MXU, f32 accumulate)
    h = jnp.dot(we_ref[...], x_ref[...], preferred_element_type=jnp.float32)
    h = jnp.maximum(h, 0.0).astype(jnp.bfloat16)                 # (HIDDEN, TM)
    # fused class + box head, single bf16 MXU pass
    out = jnp.dot(wh_ref[...], h, preferred_element_type=jnp.float32)  # (128, TM)
    probs = jax.nn.sigmoid(out)

    # scores / labels: sublane reduce over the NUM_CLASSES class rows
    cls_p = probs[:NUM_CLASSES, :]                               # (NC, TM)
    max_p = jnp.max(cls_p, axis=0)                               # (TM,)
    row = jax.lax.broadcasted_iota(jnp.int32, cls_p.shape, 0)
    labels = jnp.min(                                            # first-hit argmax
        jnp.where(cls_p >= max_p[None, :], row, NUM_CLASSES), axis=0)

    # boxes: sigmoid(cxcywh) -> xyxy (pure VPU math), scaled to orig image size
    box = probs[NUM_CLASSES:NUM_CLASSES + 4, :]                  # (4, TM): cx,cy,w,h
    xy, wh = box[0:2, :], box[2:4, :]
    xyxy = jnp.concatenate([xy - 0.5 * wh, xy + 0.5 * wh], axis=0)  # (4, TM)

    out_ref[...] = jnp.concatenate([
        xyxy * scale_ref[...],                                   # rows 0-3
        max_p[None, :],                                          # row 4
        labels.astype(jnp.float32)[None, :],                     # row 5 (exact)
        jnp.zeros((2, tm), jnp.float32),                         # rows 6-7 pad
    ], axis=0)


# ----------------------------- pallas wrapper --------------------------------
def run_fused(x_t, we_t, wh_t, scale_t, m_pad, tm):
    k = x_t.shape[0]
    return pl.pallas_call(
        fused_detect_kernel,
        out_shape=jax.ShapeDtypeStruct((8, m_pad), jnp.float32),
        grid=(m_pad // tm,),
        in_specs=[
            pl.BlockSpec((k, tm), lambda i: (0, i)),             # patch pixels
            pl.BlockSpec((HIDDEN, k), lambda i: (0, 0)),         # embed weight
            pl.BlockSpec((HEAD_N, HIDDEN), lambda i: (0, 0)),    # fused head weight
            pl.BlockSpec((4, tm), lambda i: (0, i)),             # per-query scale
        ],
        out_specs=pl.BlockSpec((8, tm), lambda i: (0, i)),       # packed outputs
        compiler_params=pltpu.CompilerParams(
            dimension_semantics=("parallel",)),
    )(x_t, we_t, wh_t, scale_t)


# ----------------------------- model wrapper ---------------------------------
def prepare_params(params):
    """One-time prep: transpose / concat / pad / bf16-cast the weights."""
    we_t = params["w_embed"].T.astype(jnp.bfloat16)              # (HIDDEN, K)
    w_head = jnp.concatenate([params["w_cls"], params["w_box"]], axis=1)
    wh_t = jnp.zeros((HEAD_N, HIDDEN), jnp.bfloat16)
    wh_t = wh_t.at[:NUM_CLASSES + 4, :].set(w_head.T.astype(jnp.bfloat16))
    return {"we_t": we_t, "wh_t": wh_t}


def model_forward(images, orig_target_sizes, prep):
    """Mirrors Model.forward(images, orig_target_sizes)."""
    b, c, h, w = images.shape
    ph = pw = PATCH
    qh, qw = h // ph, w // pw
    q = qh * qw
    m = b * q
    k = c * ph * pw

    # feature-major patch matrix (K, M): one query per lane inside the kernel
    x = images.reshape(b, c, qh, ph, qw, pw)
    x = jnp.transpose(x, (1, 3, 5, 0, 2, 4))                     # (c,ph,pw,b,qh,qw)
    x_t = x.reshape(k, m).astype(jnp.bfloat16)

    # tile sizing: smallest lane-aligned tile covering M, capped at ROW_TILE
    # (ROW_TILE keeps >=2 grid steps for large M so v7x megacore can shard).
    tm = min(ROW_TILE, _round_up(m, 128))
    m_pad = _round_up(m, tm)
    if m_pad > m:
        x_t = jnp.pad(x_t, ((0, 0), (0, m_pad - m)))

    # per-query (W, H, W, H) scale, lane-dense (4, M)
    # TODO(synk): verify (W, H) vs (H, W) convention against the real
    #             cfg.postprocessor (opaque in the spec).
    sizes_f = orig_target_sizes.astype(jnp.float32)              # (B, 2)
    scale = jnp.concatenate([sizes_f, sizes_f], axis=-1)         # (B, 4)
    scale_t = jnp.repeat(scale, q, axis=0).T                     # (4, M)
    if m_pad > m:
        scale_t = jnp.pad(scale_t, ((0, 0), (0, m_pad - m)))

    packed = run_fused(x_t, prep["we_t"], prep["wh_t"], scale_t, m_pad, tm)

    boxes = packed[:4, :m].T.reshape(b, q, 4)
    scores = packed[4, :m].reshape(b, q)
    labels = packed[5, :m].astype(jnp.int32).reshape(b, q)
    return labels, boxes, scores


def init_params(key, in_channels):
    patch_dim = in_channels * PATCH * PATCH
    k1, k2, k3 = jax.random.split(key, 3)
    return {
        "w_embed": (jax.random.normal(k1, (patch_dim, HIDDEN), jnp.float32)
                    * (1.0 / patch_dim ** 0.5)),
        "w_cls": (jax.random.normal(k2, (HIDDEN, NUM_CLASSES), jnp.float32)
                  * (1.0 / HIDDEN ** 0.5)),
        "w_box": (jax.random.normal(k3, (HIDDEN, 4), jnp.float32)
                  * (1.0 / HIDDEN ** 0.5)),
    }


# ----------------------------- main ------------------------------------------
if __name__ == "__main__":
    key = jax.random.PRNGKey(0)
    k_img, k_param = jax.random.split(key)

    B, C, H, W = 2, 3, 16, 16
    images = jax.random.normal(k_img, (B, C, H, W), jnp.float32)
    orig_target_sizes = jnp.array([[640, 480], [800, 600]], dtype=jnp.int32)

    params = init_params(k_param, C)
    prep = prepare_params(params)        # one-time weight prep (not per-forward)

    labels, boxes, scores = jax.jit(model_forward)(images, orig_target_sizes,
                                                   prep)
    jax.block_until_ready((labels, boxes, scores))

    Q = (H // PATCH) * (W // PATCH)
    assert labels.shape == (B, Q) and labels.dtype == jnp.int32
    assert boxes.shape == (B, Q, 4)
    assert scores.shape == (B, Q)
    print("KERNEL_OK")
</pallas_src>

<mosaic_0001>
module attributes {stable_mosaic.version = 11 : i64} {
  func.func @fused_detect_kernel(%arg0: i32, %arg1: memref<48x128xbf16, #tpu.memory_space<vmem>>, %arg2: memref<32x48xbf16, #tpu.memory_space<vmem>>, %arg3: memref<128x32xbf16, #tpu.memory_space<vmem>>, %arg4: memref<4x128xf32, #tpu.memory_space<vmem>>, %arg5: memref<8x128xf32, #tpu.memory_space<vmem>>) attributes {dimension_semantics = [#tpu.dimension_semantics<parallel>], iteration_bounds = array<i64: 1>, scalar_prefetch = 0 : i64, scratch_operands = 0 : i64, tpu.core_type = #tpu.core_type<tc>, window_params = [{transform_indices = @transform_0, window_bounds = array<i64: 48, 128>}, {pipeline_mode = #tpu.pipeline_mode<synchronous>, transform_indices = @transform_1, window_bounds = array<i64: 32, 48>}, {pipeline_mode = #tpu.pipeline_mode<synchronous>, transform_indices = @transform_2, window_bounds = array<i64: 128, 32>}, {transform_indices = @transform_3, window_bounds = array<i64: 4, 128>}, {transform_indices = @transform_4, window_bounds = array<i64: 8, 128>}]} {
    %c0 = arith.constant 0 : index
    %c0_0 = arith.constant 0 : index
    %0 = vector.load %arg2[%c0, %c0_0] : memref<32x48xbf16, #tpu.memory_space<vmem>>, vector<32x48xbf16>
    %c0_1 = arith.constant 0 : index
    %c0_2 = arith.constant 0 : index
    %1 = vector.load %arg1[%c0_1, %c0_2] : memref<48x128xbf16, #tpu.memory_space<vmem>>, vector<48x128xbf16>
    %cst = arith.constant dense<0.000000e+00> : vector<32x128xf32>
    %2 = tpu.matmul %0, %1, %cst {dimension_numbers = #tpu.dot_dimension_numbers<[1], [0], [0], [1], [0, 0, 1, 1], [], []>} : vector<32x48xbf16>, vector<48x128xbf16>, vector<32x128xf32> -> vector<32x128xf32>
    %cst_3 = arith.constant 0.000000e+00 : f32
    %3 = vector.broadcast %cst_3 : f32 to vector<32x128xf32>
    %4 = arith.maximumf %2, %3 : vector<32x128xf32>
    %5 = arith.truncf %4 : vector<32x128xf32> to vector<32x128xbf16>
    %c0_4 = arith.constant 0 : index
    %c0_5 = arith.constant 0 : index
    %6 = vector.load %arg3[%c0_4, %c0_5] : memref<128x32xbf16, #tpu.memory_space<vmem>>, vector<128x32xbf16>
    %cst_6 = arith.constant dense<0.000000e+00> : vector<128x128xf32>
    %7 = tpu.matmul %6, %5, %cst_6 {dimension_numbers = #tpu.dot_dimension_numbers<[1], [0], [0], [1], [0, 0, 1, 1], [], []>} : vector<128x32xbf16>, vector<32x128xbf16>, vector<128x128xf32> -> vector<128x128xf32>
    %8 = arith.negf %7 : vector<128x128xf32>
    %9 = math.exp %8 : vector<128x128xf32>
    %cst_7 = arith.constant 1.000000e+00 : f32
    %10 = vector.broadcast %cst_7 : f32 to vector<128x128xf32>
    %11 = arith.addf %10, %9 : vector<128x128xf32>
    %12 = arith.divf %10, %11 : vector<128x128xf32>
    %13 = vector.extract_strided_slice %12 {offsets = [0, 0], sizes = [8, 128], strides = [1, 1]} : vector<128x128xf32> to vector<8x128xf32>
    %cst_8 = arith.constant dense<0xFF800000> : vector<128xf32>
    %14 = vector.multi_reduction <maximumf>, %13, %cst_8 [0] : vector<8x128xf32> to vector<128xf32>
    %15 = tpu.iota {dimensions = array<i32: 0>} : vector<8x128xi32>
    %16 = vector.shape_cast %14 : vector<128xf32> to vector<1x128xf32>
    %17 = vector.broadcast %16 : vector<1x128xf32> to vector<8x128xf32>
    %18 = arith.cmpf oge, %13, %17 : vector<8x128xf32>
    %c8_i32 = arith.constant 8 : i32
    %19 = vector.broadcast %c8_i32 : i32 to vector<8x128xi32>
    %20 = arith.select %18, %15, %19 : vector<8x128xi1>, vector<8x128xi32>
    %cst_9 = arith.constant dense<2147483647> : vector<128xi32>
    %21 = vector.multi_reduction <minsi>, %20, %cst_9 [0] : vector<8x128xi32> to vector<128xi32>
    %22 = vector.extract_strided_slice %12 {offsets = [8, 0], sizes = [4, 128], strides = [1, 1]} : vector<128x128xf32> to vector<4x128xf32>
    %23 = vector.extract_strided_slice %22 {offsets = [0, 0], sizes = [2, 128], strides = [1, 1]} : vector<4x128xf32> to vector<2x128xf32>
    %24 = vector.extract_strided_slice %22 {offsets = [2, 0], sizes = [2, 128], strides = [1, 1]} : vector<4x128xf32> to vector<2x128xf32>
    %cst_10 = arith.constant 5.000000e-01 : f32
    %25 = vector.broadcast %cst_10 : f32 to vector<2x128xf32>
    %26 = arith.mulf %25, %24 : vector<2x128xf32>
    %27 = arith.subf %23, %26 : vector<2x128xf32>
    %cst_11 = arith.constant 5.000000e-01 : f32
    %28 = vector.broadcast %cst_11 : f32 to vector<2x128xf32>
    %29 = arith.mulf %28, %24 : vector<2x128xf32>
    %30 = arith.addf %23, %29 : vector<2x128xf32>
    %31 = tpu.concatenate %27, %30 in 0 : vector<2x128xf32>, vector<2x128xf32> -> vector<4x128xf32>
    %c0_12 = arith.constant 0 : index
    %c0_13 = arith.constant 0 : index
    %32 = vector.load %arg4[%c0_12, %c0_13] : memref<4x128xf32, #tpu.memory_space<vmem>>, vector<4x128xf32>
    %33 = arith.mulf %31, %32 : vector<4x128xf32>
    %34 = vector.shape_cast %14 : vector<128xf32> to vector<1x128xf32>
    %35 = arith.sitofp %21 : vector<128xi32> to vector<128xf32>
    %36 = vector.shape_cast %35 : vector<128xf32> to vector<1x128xf32>
    %cst_14 = arith.constant 0.000000e+00 : f32
    %37 = vector.broadcast %cst_14 : f32 to vector<2x128xf32>
    %38 = tpu.concatenate %33, %34, %36, %37 in 0 : vector<4x128xf32>, vector<1x128xf32>, vector<1x128xf32>, vector<2x128xf32> -> vector<8x128xf32>
    %c0_15 = arith.constant 0 : index
    %c0_16 = arith.constant 0 : index
    %39 = vector.load %arg5[%c0_15, %c0_16] : memref<8x128xf32, #tpu.memory_space<vmem>>, vector<8x128xf32>
    tpu.vector_store %arg5[%c0_15, %c0_16], %38 {strides = array<i32>} : memref<8x128xf32, #tpu.memory_space<vmem>>, vector<8x128xf32>,
    return
  }
  func.func @transform_0(%arg0: i32) -> (i32, i32) {
    %c0_i32 = arith.constant 0 : i32
    %c0_i32_0 = arith.constant 0 : i32
    return %c0_i32, %arg0 : i32, i32
  }
  func.func @transform_1(%arg0: i32) -> (i32, i32) {
    %c0_i32 = arith.constant 0 : i32
    %c0_i32_0 = arith.constant 0 : i32
    %c0_i32_1 = arith.constant 0 : i32
    return %c0_i32, %c0_i32_0 : i32, i32
  }
  func.func @transform_2(%arg0: i32) -> (i32, i32) {
    %c0_i32 = arith.constant 0 : i32
    %c0_i32_0 = arith.constant 0 : i32
    %c0_i32_1 = arith.constant 0 : i32
    return %c0_i32, %c0_i32_0 : i32, i32
  }
  func.func @transform_3(%arg0: i32) -> (i32, i32) {
    %c0_i32 = arith.constant 0 : i32
    %c0_i32_0 = arith.constant 0 : i32
    return %c0_i32, %arg0 : i32, i32
  }
  func.func @transform_4(%arg0: i32) -> (i32, i32) {
    %c0_i32 = arith.constant 0 : i32
    %c0_i32_0 = arith.constant 0 : i32
    return %c0_i32, %arg0 : i32, i32
  }
}

</mosaic_0001>

<bundles_post_ra>
// kernel: squeeze.2
= control target key start
LH: loop header
LB: loop body
LE: loop exit
PB: predicated region body
PF: predicated region fallthrough
CT: control target
= control target key end

     0   :  { %s85_s0 = inlined_call_operand.vmem [shape: f32[32], index: 0, kind: input, shape index: {}]   ;;  %s86_s1 = inlined_call_operand.hbm [shape: f32[2,16], index: 1, kind: output, shape index: {}]  }
   0x1   :  { %v5_v0 = vld [vmem:[%s85_s0] sm:$0x1] }
   0x2   :  { %2 = vsyncpa [#allocation1], 0  ;;  %6 = vst [vmem:[#allocation3] sm:$0x1] %v5_v0  ;;  %vm8_vm0 = vcmask 130048   ;;  %s58_s0 = smov 112  }
   0x3   :  { %s59_s8 = smov [#allocation0]  }
   0x4   :  { %s26_s9 = sshll.u32 %s59_s8, 4  ;;  %s27_s9 = int_to_ptr.vmem [resolvable:$true] %s26_s9 }
   0x5   :  { %s34_s10 = scalar_lea.vmem %s27_s9, 32  ;;  %p39_p1 = scmp.lt.s32.totalorder %s27_s9, %s27_s9 }
   0x6   :  { %p35_p0 = scmp.ne.s32.totalorder %s27_s9, %s34_s10  ;;  %p40_p2 = scmp.lt.s32.totalorder %s34_s10, %s34_s10 }
   0x8   :  { %p41_p3 = por %p40_p2, %p39_p1 }
   0x9   :  { %v10_v1 = vld [vmem:[#allocation3] sm:$0x1]  }
   0xa   :  { %v7_v2 = vld [vmem:[#allocation3] sm:$0x1]   ;;  %11 = vrot.lane.b32.xlu0 %v10_v1, %s58_s0  ;;  %p42_p4 = pnand %p41_p3, %p35_p0 }
   0xb   :  { %9 = vst.msk [vmem:[#allocation2] sm:$0x1] %vm8_vm0, %v7_v2  }
  0x7c   :  { %v12_v3 = vpop.permute.xlu0 %11  }
  0x7d   :  { %15 = vst.msk [vmem:[#allocation2 + $0x1] sm:$0x1] %vm8_vm0, %v12_v3  }
  0x84   :  { %v19_v4 = vld [vmem:[#allocation2] sm:$0x3] }
  0x85   :  { %21 = vst [vmem:[#allocation0] sm:$0x3] %v19_v4 }
  0x86   :  { %45 = shalt.err (!%p42_p4)
}
  0x87   :  { %s46_s13 = scalar_lea.hbm %s86_s1, 32 }
  0x88   :  { %p47_p5 = scmp.ne.s32.totalorder %s86_s1, %s46_s13  ;;  %p50_p6 = scmp.lt.u32.totalorder %s46_s13, %s86_s1 }
  0x8a   :  { %p52_p7 = pnand %p50_p6, %p47_p5 }
  0x8c   :  { %55 = shalt.err (!%p52_p7)
}
  0x8d   :  { %29 = dma.vmem_to_hbm [thread:$0]  %s27_s9, 32, %s86_s1, [#allocation1]  }
  0x8e   :  { %56 = dma.done.wait [#allocation1], 32  }
  0x8f   :  { %57 = vsyncadd [#allocation1], 4294967264 }
  0x90   :  { %31 = vsyncpa [#allocation1], 1 }

// kernel: model_forward.1
= control target key start
LH: loop header
LB: loop body
LE: loop exit
PB: predicated region body
PF: predicated region fallthrough
CT: control target
= control target key end

     0   :  { %vm56_vm0 = vcmask 392192   ;;  %vm174_vm1 = vcmask 261120   ;;  %v300_v52 = vlaneseq  ;;  %vm322_vm2 = vcmask 1041408   ;;  %s511_s0 = inlined_call_operand.vmem [shape: bf16[48,128], index: 0, kind: input, shape index: {}]   ;;  %s512_s1 = inlined_call_operand.vmem [shape: bf16[32,48], index: 1, kind: input, shape index: {}]   ;;  %s513_s2 = inlined_call_operand.vmem [shape: bf16[128,32], index: 2, kind: input, shape index: {}]   ;;  %s514_s3 = inlined_call_operand.vmem [shape: f32[4,128], index: 3, kind: input, shape index: {}]   ;;  %s515_s4 = inlined_call_operand.vmem [shape: f32[8,128], index: 4, kind: output, shape index: {}]  }
   0x1   :  { %v412_v0 = vld [vmem:[%s511_s0] sm:$0xff]   ;;  %v413_v1 = vld [vmem:[%s511_s0 + $0x8] sm:$0xff]   ;;  %v414_v3 = vld [vmem:[%s511_s0 + $0x10] sm:$0xff]   ;;  %vm327_vm3 = vcmask 1043456   ;;  %vm329_vm8 = vcmask 1044480   ;;  %vm331_vm9 = vcmask 1045504  }
   0x2   :  { %378 = vmatprep.subr.bf16.mxu0 %v412_v0  ;;  %v415_v2 = vld [vmem:[%s512_s1] sm:$0xff]   ;;  %v416_v4 = vld [vmem:[%s512_s1 + $0x8] sm:$0xff]   ;;  %v419_v6 = vld [vmem:[%s513_s2 + $0x10] sm:$0xff]   ;;  %v301_v59 = vshrl.u32 %v300_v52, 7 }
   0x3   :  { %379 = vmatpush3.bf16.msra.mxu0 %v412_v0  ;;  %384 = vmatprep.mubr.msk.bf16.mxu0 %vm56_vm0, %v415_v2  ;;  %v417_v5 = vld [vmem:[%s513_s2] sm:$0xff]   ;;  %v418_v17 = vld [vmem:[%s513_s2 + $0x8] sm:$0xff]   ;;  %v420_v18 = vld [vmem:[%s513_s2 + $0x18] sm:$0xff]  }
   0x4   :  { %380 = vmatprep.subr.bf16.mxu0 %v413_v1  ;;  %396 = vmatprep.mubr.msk.bf16.mxu1 %vm174_vm1, %v419_v6  ;;  %v421_v19 = vld [vmem:[%s513_s2 + $0x20] sm:$0xff]   ;;  %v422_v20 = vld [vmem:[%s513_s2 + $0x28] sm:$0xff]   ;;  %v423_v21 = vld [vmem:[%s513_s2 + $0x30] sm:$0xff]  }
   0x5   :  { %v424_v22 = vld [vmem:[%s513_s2 + $0x38] sm:$0xff]   ;;  %v324_v58 = vld [vmem:[%s514_s3] sm:$0xf] }
   0x7   :  { %381 = vmatpush3.bf16.msra.mxu0 %v413_v1 }
   0x8   :  { %382 = vmatprep.subr.bf16.mxu0 %v414_v3 }
   0xb   :  { %383 = vmatpush3.bf16.msra.mxu0 %v414_v3 }
   0xe   :  { %385 = vmatmul.mubr.msk.bf16.vlgmr.msra.gmra.mrb[0].mxu0 %vm56_vm0, %v416_v4 }
   0xf   :  { %392 = vmatprep.mubr.msk.bf16.mxu0 %vm174_vm1, %v417_v5 }
  0xe1   :  { %v386_v7 = vpop.f32.mrb[0].mxu0 }
  0xe2   :  { %v97_v8 = vpop.f32.mrb[1].mxu0  ;;  %v114_v10 = vmax.f32 %v386_v7, 0.0 }
  0xe3   :  { %v387_v9 = vpop.f32.mrb[2].mxu0  ;;  %v112_v13 = vmax.f32 %v97_v8, 0.0 }
  0xe4   :  { %v115_v11 = vmax.f32 %v387_v9, 0.0  ;;  %v100_v12 = vpop.f32.mrb[3].mxu0 }
  0xe5   :  { %v113_v14 = vmax.f32 %v100_v12, 0.0 }
  0xe6   :  { %v117_v15 = vpack.c.bf16 %v115_v11, %v114_v10 }
  0xe7   :  { %v116_v16 = vpack.c.bf16 %v113_v14, %v112_v13 }
  0xe9   :  { %388 = vmatprep.subr.bf16.mxu0 %v116_v16  ;;  %408 = vmatprep.subr.bf16.mxu1 %v116_v16 }
  0xea   :  { %389 = vmatpush3.bf16.msra.mxu0 %v116_v16  ;;  %410 = vmatpush3.bf16.msra.mxu1 %v116_v16 }
  0xeb   :  { %390 = vmatprep.subr.bf16.mxu0 %v117_v15  ;;  %409 = vmatprep.subr.bf16.mxu1 %v117_v15 }
  0xee   :  { %391 = vmatpush3.bf16.msra.mxu0 %v117_v15  ;;  %411 = vmatpush3.bf16.msra.mxu1 %v117_v15 }
  0xf1   :  { %393 = vmatmul.mubr.msk.bf16.vlgmr.msra.gmra.mrb[4].mxu0 %vm174_vm1, %v418_v17  ;;  %397 = vmatmul.mubr.msk.bf16.vlgmr.msra.gmra.mrb[0].mxu1 %vm174_vm1, %v420_v18 }
  0xf2   :  { %400 = vmatprep.mubr.msk.bf16.mxu1 %vm174_vm1, %v421_v19 }
  0xf9   :  { %401 = vmatmul.mubr.msk.bf16.gmra.mrb[4].mxu1 %vm174_vm1, %v422_v20 }
  0xfa   :  { %404 = vmatprep.mubr.msk.bf16.mxu1 %vm174_vm1, %v423_v21 }
 0x101   :  { %405 = vmatmul.mubr.msk.bf16.gmra.mrb[8].mxu1 %vm174_vm1, %v424_v22 }
 0x1c4   :  { %v394_v23 = vpop.f32.mrb[4].mxu0  ;;  %v398_v24 = vpop.f32.mrb[0].mxu1 }
 0x1c5   :  { %v233_v25 = vpop.f32.mrb[5].mxu0  ;;  %v247_v26 = vpop.f32.mrb[1].mxu1 }
 0x1c6   :  { %v361_v27 = vmul.f32 -1.442695, %v233_v25  ;;  %v395_v28 = vpop.f32.mrb[6].mxu0  ;;  %v399_v29 = vpop.f32.mrb[2].mxu1 }
 0x1c7   :  { %v236_v30 = vpop.f32.mrb[7].mxu0  ;;  %v249_v31 = vpop.f32.mrb[3].mxu1 }
 0x1c8   :  { %425 = vpow2.f32 %v361_v27  ;;  %v362_v32 = vmul.f32 -1.442695, %v236_v30 }
 0x1ca   :  { %427 = vpow2.f32 %v362_v32 }
 0x1cc   :  { %v402_v33 = vpop.f32.mrb[4].mxu1 }
 0x1cd   :  { %v259_v34 = vpop.f32.mrb[5].mxu1 }
 0x1ce   :  { %v403_v35 = vpop.f32.mrb[6].mxu1 }
 0x1cf   :  { %v261_v36 = vpop.f32.mrb[7].mxu1 }
 0x1d2   :  { %v426_v37 = vpop.eup %425 }
 0x1d3   :  { %v288_v38 = vadd.f32 1.0, %v426_v37 }
 0x1d4   :  { %v428_v39 = vpop.eup %427  ;;  %v406_v40 = vpop.f32.mrb[8].mxu1 }
 0x1d5   :  { %429 = vrcp.f32 %v288_v38  ;;  %v289_v41 = vadd.f32 1.0, %v428_v39  ;;  %v271_v42 = vpop.f32.mrb[9].mxu1 }
 0x1d6   :  { %v407_v43 = vpop.f32.mrb[10].mxu1 }
 0x1d7   :  { %431 = vrcp.f32 %v289_v41  ;;  %v273_v44 = vpop.f32.mrb[11].mxu1 }
 0x1df   :  { %v430_v45 = vpop.eup %429 }
 0x1e0   :  { %v294_v46 = vrot.slane %v430_v45, 4 }
 0x1e1   :  { %v432_v47 = vpop.eup %431 }
 0x1e2   :  { %v295_v48 = vmax.f32 %v430_v45, %v294_v46  ;;  %v313_v49 = vmul.f32 0.5, %v432_v47 }
 0x1e4   :  { %v296_v50 = vrot.slane %v295_v48, 2  ;;  %v315_v51 = vrot.slane %v313_v49, 2 }
 0x1e6   :  { %v297_v53 = vmax.f32 %v295_v48, %v296_v50  ;;  %v318_v54 = vadd.f32 %v432_v47, %v315_v51  ;;  %v317_v56 = vsub.f32 %v432_v47, %v315_v51 }
 0x1e8   :  { %v298_v55 = vrot.slane %v297_v53, 1  ;;  %v320_v57 = vrot.slane %v318_v54, 6 }
 0x1ea   :  { %v299_v60 = vmax.f32 %v297_v53, %v298_v55  ;;  %v323_v61 = vsel %vm322_vm2, %v317_v56, %v320_v57 }
 0x1eb   :  { %v325_v62 = vmul.f32 %v324_v58, %v323_v61 }
 0x1ec   :  { %vm302_vm4 = vcmp.ge.f32.partialorder %v430_v45, %v299_v60 }
 0x1ed   :  { %v303_v63 = vsel %vm302_vm4, %v301_v59, 8  ;;  %v328_v0 = vsel %vm327_vm3, %v325_v62, %v299_v60 }
 0x1ee   :  { %v304_v1 = vrot.slane %v303_v63, 4 }
 0x1f0   :  { %vm305_vm5 = vcmp.lt.s32.totalorder %v303_v63, %v304_v1 }
 0x1f1   :  { %v306_v2 = vsel %vm305_vm5, %v303_v63, %v304_v1 }
 0x1f2   :  { %v307_v3 = vrot.slane %v306_v2, 2 }
 0x1f4   :  { %vm308_vm6 = vcmp.lt.s32.totalorder %v306_v2, %v307_v3 }
 0x1f5   :  { %v309_v4 = vsel %vm308_vm6, %v306_v2, %v307_v3 }
 0x1f6   :  { %v310_v5 = vrot.slane %v309_v4, 1 }
 0x1f8   :  { %vm311_vm7 = vcmp.lt.s32.totalorder %v309_v4, %v310_v5 }
 0x1f9   :  { %v312_v6 = vsel %vm311_vm7, %v309_v4, %v310_v5 }
 0x1fa   :  { %v326_v7 = vcvt.s32.f32 %v312_v6 }
 0x1fc   :  { %v330_v8 = vsel %vm329_vm8, %v328_v0, %v326_v7 }
 0x1fd   :  { %v332_v9 = vsel %vm331_vm9, %v330_v8, 0.0 }
 0x1fe   :  { %333 = vst [vmem:[%s515_s4] sm:$0xff] %v332_v9 }

</bundles_post_ra>
